<compile_context>
chip_gen: v7x
topology: tpu7x:2x2x1
jax: 0.10.0
libtpu: 0.0.40
codegen_flags: <defaults>
</compile_context>

<pallas_src>
import functools

import jax
import jax.numpy as jnp
from jax.experimental import pallas as pl
from jax.experimental.pallas import tpu as pltpu


def _ce2d_kernel(logits_ref, labels_ref, *rest, ignore_label, hw, has_weight):
    if has_weight:
        w_ref, sums_ref, wsums_ref, sum_acc, wsum_acc = rest
    else:
        w_ref = None
        sums_ref, wsums_ref, sum_acc, wsum_acc = rest

    j = pl.program_id(1)

    @pl.when(j == 0)
    def _():
        sum_acc[...] = jnp.zeros_like(sum_acc)
        wsum_acc[...] = jnp.zeros_like(wsum_acc)

    x = logits_ref[0].astype(jnp.float32)        # (C, T): channels=sublanes, pixels=lanes
    labels = labels_ref[0]                        # (1, T) int32
    _, t_dim = x.shape

    # Global pixel index -> mask the ragged tail of the last tile (no host pad).
    lane_idx = jax.lax.broadcasted_iota(jnp.int32, (1, t_dim), 1)
    in_bounds = (j * t_dim + lane_idx) < hw

    valid = jnp.logical_and(labels >= 0, labels != ignore_label)
    valid = jnp.logical_and(valid, in_bounds)                       # (1, T) bool
    safe_labels = jnp.where(valid, labels, 0)

    # log-softmax over the channel (sublane) axis
    m = jnp.max(x, axis=0, keepdims=True)                           # (1, T)
    lse = jnp.log(jnp.sum(jnp.exp(x - m), axis=0, keepdims=True)) + m

    # gather logit[target] via one-hot compare on the channel axis
    c_iota = jax.lax.broadcasted_iota(jnp.int32, x.shape, 0)        # (C, T)
    onehot = c_iota == safe_labels                                   # (C, T)
    logit_t = jnp.sum(jnp.where(onehot, x, 0.0), axis=0, keepdims=True)

    nll = lse - logit_t                                              # (1, T)

    # Elementwise accumulation (VPU only); use where (not *mask) so NaN/garbage
    # in masked-out / out-of-bounds columns never contaminates the sums.
    if has_weight:
        wv = w_ref[...].astype(jnp.float32)                          # (C, 1)
        w_t = jnp.sum(jnp.where(onehot, wv, 0.0), axis=0, keepdims=True)
        sum_acc[...] += jnp.where(valid, nll * w_t, 0.0)
        wsum_acc[...] += jnp.where(valid, w_t, 0.0)
    else:
        sum_acc[...] += jnp.where(valid, nll, 0.0)
        wsum_acc[...] += valid.astype(jnp.float32)

    @pl.when(j == pl.num_programs(1) - 1)
    def _():
        s = jnp.sum(sum_acc[...], axis=1, keepdims=True)             # (1, 1)
        ws = jnp.sum(wsum_acc[...], axis=1, keepdims=True)           # (1, 1)
        sums_ref[...] = s.reshape(1, 1, 1)
        wsums_ref[...] = ws.reshape(1, 1, 1)


def cross_entropy_2d(predict, target, weight=None, reduction='mean',
                     ignore_label=255, tile_p=None):
    """predict: (n, c, h, w) float; target: (n, h, w) int. Returns scalar loss."""
    # TODO(synk): 'none' reduction (ragged per-valid-pixel output) not implemented.
    assert reduction in ('mean', 'sum')
    n, c, h, w = predict.shape
    assert target.shape == (n, h, w)
    hw = h * w

    # Zero-copy views: stay in NCHW; pixels land on the lane axis.
    logits = predict.reshape(n, c, hw)
    labels = target.reshape(n, 1, hw).astype(jnp.int32)

    itemsize = predict.dtype.itemsize
    if tile_p is None:
        # target ~1 MiB of logits per block; multiple of 128, clamped to [128, 8192]
        tile_p = (1 << 20) // max(1, c * itemsize)
    tile_p = max(128, min(8192, (int(tile_p) // 128) * 128))

    if hw <= tile_p:
        tile_hw = hw              # full-extent block (allowed regardless of 128-div)
        grid_j = 1
    else:
        tile_hw = tile_p          # multiple of 128; last tile may be ragged (masked)
        grid_j = pl.cdiv(hw, tile_hw)

    has_weight = weight is not None

    kernel = functools.partial(_ce2d_kernel, ignore_label=ignore_label,
                               hw=hw, has_weight=has_weight)

    in_specs = [
        pl.BlockSpec((1, c, tile_hw), lambda b, j: (b, 0, j)),
        pl.BlockSpec((1, 1, tile_hw), lambda b, j: (b, 0, j)),
    ]
    inputs = [logits, labels]
    if has_weight:
        wcol = jnp.asarray(weight, jnp.float32).reshape(c, 1)
        in_specs.append(pl.BlockSpec((c, 1), lambda b, j: (0, 0)))
        inputs.append(wcol)

    out_shape = (jax.ShapeDtypeStruct((n, 1, 1), jnp.float32),
                 jax.ShapeDtypeStruct((n, 1, 1), jnp.float32))
    out_specs = [pl.BlockSpec((1, 1, 1), lambda b, j: (b, 0, 0)),
                 pl.BlockSpec((1, 1, 1), lambda b, j: (b, 0, 0))]

    scratch_shapes = [pltpu.VMEM((1, tile_hw), jnp.float32),
                      pltpu.VMEM((1, tile_hw), jnp.float32)]

    total_px = n * hw
    cost = pl.CostEstimate(
        flops=8 * total_px * c,
        transcendentals=total_px * (c + 1),
        bytes_accessed=total_px * c * itemsize + total_px * 4 + 8 * n,
    )

    sums, wsums = pl.pallas_call(
        kernel,
        out_shape=out_shape,
        grid_spec=pltpu.PrefetchScalarGridSpec(
            num_scalar_prefetch=0,
            grid=(n, grid_j),
            in_specs=in_specs,
            out_specs=out_specs,
            scratch_shapes=scratch_shapes,
        ),
        compiler_params=pltpu.CompilerParams(
            dimension_semantics=("parallel", "arbitrary")),
        cost_estimate=cost,
    )(*inputs)

    num = jnp.sum(sums)
    if reduction == 'sum':
        return num
    return num / jnp.sum(wsums)


def _reference(predict, target, weight=None, ignore_label=255, reduction='mean'):
    n, c, h, w = predict.shape
    logits = jnp.transpose(predict, (0, 2, 3, 1)).reshape(-1, c).astype(jnp.float32)
    labels = target.reshape(-1).astype(jnp.int32)
    valid = jnp.logical_and(labels >= 0, labels != ignore_label)
    safe = jnp.where(valid, labels, 0)
    logp = jax.nn.log_softmax(logits, axis=-1)
    nll = -jnp.take_along_axis(logp, safe[:, None], axis=-1)[:, 0]
    wvec = jnp.ones((c,), jnp.float32) if weight is None else jnp.asarray(weight, jnp.float32)
    wt = wvec[safe]
    num = jnp.sum(nll * wt * valid)
    if reduction == 'sum':
        return num
    return num / jnp.sum(wt * valid)


if __name__ == "__main__":
    key = jax.random.PRNGKey(0)
    k1, k2, k3, k4 = jax.random.split(key, 4)

    n, c, h, w = 2, 4, 16, 16
    predict = jax.random.normal(k1, (n, c, h, w), jnp.float32)
    target = jax.random.randint(k2, (n, h, w), 0, c).astype(jnp.int32)
    ignore_mask = jax.random.uniform(k3, (n, h, w)) < 0.2
    target = jnp.where(ignore_mask, 255, target)

    # unweighted mean
    loss = jax.block_until_ready(cross_entropy_2d(predict, target))
    ref = _reference(predict, target)
    assert jnp.allclose(loss, ref, rtol=1e-5, atol=1e-5), (loss, ref)

    # class-weighted mean
    wvec = jnp.array([0.5, 1.0, 2.0, 1.5], jnp.float32)
    loss_w = jax.block_until_ready(cross_entropy_2d(predict, target, weight=wvec))
    ref_w = _reference(predict, target, weight=wvec)
    assert jnp.allclose(loss_w, ref_w, rtol=1e-5, atol=1e-5), (loss_w, ref_w)

    # ragged-tail path: H*W=324 with tile_p=128 forces a partial last tile,
    # exercising the in-kernel out-of-bounds masking (no host-side pad).
    n2, c2, h2, w2 = 2, 5, 18, 18
    p2 = jax.random.normal(k4, (n2, c2, h2, w2), jnp.float32)
    t2 = jax.random.randint(k2, (n2, h2, w2), 0, c2).astype(jnp.int32)
    t2 = jnp.where(jax.random.uniform(k3, (n2, h2, w2)) < 0.2, 255, t2)
    loss2 = jax.block_until_ready(cross_entropy_2d(p2, t2, tile_p=128))
    ref2 = _reference(p2, t2)
    assert jnp.allclose(loss2, ref2, rtol=1e-5, atol=1e-5), (loss2, ref2)

    print("KERNEL_OK")
</pallas_src>

<mosaic_0001>
module attributes {stable_mosaic.version = 11 : i64} {
  func.func @_ce2d_kernel(%arg0: i32, %arg1: i32, %arg2: memref<1x4x256xf32, #tpu.memory_space<vmem>>, %arg3: memref<1x1x256xi32, #tpu.memory_space<vmem>>, %arg4: memref<1x1x1xf32, #tpu.memory_space<vmem>>, %arg5: memref<1x1x1xf32, #tpu.memory_space<vmem>>, %arg6: memref<1x256xf32, #tpu.memory_space<vmem>>, %arg7: memref<1x256xf32, #tpu.memory_space<vmem>>) attributes {dimension_semantics = [#tpu.dimension_semantics<parallel>, #tpu.dimension_semantics<arbitrary>], iteration_bounds = array<i64: 2, 1>, scalar_prefetch = 0 : i64, scratch_operands = 2 : i64, tpu.core_type = #tpu.core_type<tc>, window_params = [{transform_indices = @transform_0, window_bounds = array<i64: 1, 4, 256>}, {transform_indices = @transform_1, window_bounds = array<i64: 1, 1, 256>}, {transform_indices = @transform_2, window_bounds = array<i64: 1, 1, 1>}, {transform_indices = @transform_3, window_bounds = array<i64: 1, 1, 1>}]} {
    %c0_i32 = arith.constant 0 : i32
    %0 = arith.cmpi eq, %arg1, %c0_i32 : i32
    %1 = arith.extui %0 : i1 to i32
    %c0_i32_0 = arith.constant 0 : i32
    %2 = arith.cmpi ne, %1, %c0_i32_0 : i32
    scf.if %2 {
      %cst_23 = arith.constant 0.000000e+00 : f32
      %51 = vector.broadcast %cst_23 : f32 to vector<1x256xf32>
      %c0_24 = arith.constant 0 : index
      %c0_25 = arith.constant 0 : index
      %52 = vector.load %arg6[%c0_24, %c0_25] : memref<1x256xf32, #tpu.memory_space<vmem>>, vector<1x256xf32>
      tpu.vector_store %arg6[%c0_24, %c0_25], %51 {strides = array<i32>} : memref<1x256xf32, #tpu.memory_space<vmem>>, vector<1x256xf32>,
      %cst_26 = arith.constant 0.000000e+00 : f32
      %53 = vector.broadcast %cst_26 : f32 to vector<1x256xf32>
      %c0_27 = arith.constant 0 : index
      %c0_28 = arith.constant 0 : index
      %54 = vector.load %arg7[%c0_27, %c0_28] : memref<1x256xf32, #tpu.memory_space<vmem>>, vector<1x256xf32>
      tpu.vector_store %arg7[%c0_27, %c0_28], %53 {strides = array<i32>} : memref<1x256xf32, #tpu.memory_space<vmem>>, vector<1x256xf32>,
    } else {
    }
    %c0 = arith.constant 0 : index
    %c0_1 = arith.constant 0 : index
    %c0_2 = arith.constant 0 : index
    %3 = vector.load %arg2[%c0, %c0_1, %c0_2] : memref<1x4x256xf32, #tpu.memory_space<vmem>>, vector<1x4x256xf32>
    %4 = vector.shape_cast %3 : vector<1x4x256xf32> to vector<4x256xf32>
    %c0_3 = arith.constant 0 : index
    %c0_4 = arith.constant 0 : index
    %c0_5 = arith.constant 0 : index
    %5 = vector.load %arg3[%c0_3, %c0_4, %c0_5] : memref<1x1x256xi32, #tpu.memory_space<vmem>>, vector<1x1x256xi32>
    %6 = vector.shape_cast %5 : vector<1x1x256xi32> to vector<1x256xi32>
    %7 = tpu.iota {dimensions = array<i32: 1>} : vector<1x256xi32>
    %c256_i32 = arith.constant 256 : i32
    %8 = arith.muli %arg1, %c256_i32 : i32
    %9 = vector.broadcast %8 : i32 to vector<1x256xi32>
    %10 = arith.addi %9, %7 : vector<1x256xi32>
    %c256_i32_6 = arith.constant 256 : i32
    %11 = vector.broadcast %c256_i32_6 : i32 to vector<1x256xi32>
    %12 = arith.cmpi slt, %10, %11 : vector<1x256xi32>
    %c0_i32_7 = arith.constant 0 : i32
    %13 = vector.broadcast %c0_i32_7 : i32 to vector<1x256xi32>
    %14 = arith.cmpi sge, %6, %13 : vector<1x256xi32>
    %c255_i32 = arith.constant 255 : i32
    %15 = vector.broadcast %c255_i32 : i32 to vector<1x256xi32>
    %16 = arith.cmpi ne, %6, %15 : vector<1x256xi32>
    %17 = arith.andi %14, %16 : vector<1x256xi1>
    %18 = arith.andi %17, %12 : vector<1x256xi1>
    %c0_i32_8 = arith.constant 0 : i32
    %19 = vector.broadcast %c0_i32_8 : i32 to vector<1x256xi32>
    %20 = arith.select %18, %6, %19 : vector<1x256xi1>, vector<1x256xi32>
    %cst = arith.constant dense<0xFF800000> : vector<256xf32>
    %21 = vector.multi_reduction <maximumf>, %4, %cst [0] : vector<4x256xf32> to vector<256xf32>
    %22 = vector.shape_cast %21 : vector<256xf32> to vector<1x256xf32>
    %23 = vector.broadcast %22 : vector<1x256xf32> to vector<4x256xf32>
    %24 = arith.subf %4, %23 : vector<4x256xf32>
    %25 = math.exp %24 : vector<4x256xf32>
    %cst_9 = arith.constant dense<0.000000e+00> : vector<256xf32>
    %26 = vector.multi_reduction <add>, %25, %cst_9 [0] : vector<4x256xf32> to vector<256xf32>
    %27 = vector.shape_cast %26 : vector<256xf32> to vector<1x256xf32>
    %28 = math.log %27 : vector<1x256xf32>
    %29 = arith.addf %28, %22 : vector<1x256xf32>
    %30 = tpu.iota {dimensions = array<i32: 0>} : vector<4x256xi32>
    %31 = vector.broadcast %20 : vector<1x256xi32> to vector<4x256xi32>
    %32 = arith.cmpi eq, %30, %31 : vector<4x256xi32>
    %cst_10 = arith.constant 0.000000e+00 : f32
    %33 = vector.broadcast %cst_10 : f32 to vector<4x256xf32>
    %34 = arith.select %32, %4, %33 : vector<4x256xi1>, vector<4x256xf32>
    %cst_11 = arith.constant dense<0.000000e+00> : vector<256xf32>
    %35 = vector.multi_reduction <add>, %34, %cst_11 [0] : vector<4x256xf32> to vector<256xf32>
    %36 = vector.shape_cast %35 : vector<256xf32> to vector<1x256xf32>
    %37 = arith.subf %29, %36 : vector<1x256xf32>
    %c0_12 = arith.constant 0 : index
    %c0_13 = arith.constant 0 : index
    %38 = vector.load %arg6[%c0_12, %c0_13] : memref<1x256xf32, #tpu.memory_space<vmem>>, vector<1x256xf32>
    %cst_14 = arith.constant 0.000000e+00 : f32
    %39 = vector.broadcast %cst_14 : f32 to vector<1x256xf32>
    %40 = arith.select %18, %37, %39 : vector<1x256xi1>, vector<1x256xf32>
    %41 = arith.addf %38, %40 : vector<1x256xf32>
    %c0_15 = arith.constant 0 : index
    %c0_16 = arith.constant 0 : index
    %42 = vector.load %arg6[%c0_15, %c0_16] : memref<1x256xf32, #tpu.memory_space<vmem>>, vector<1x256xf32>
    tpu.vector_store %arg6[%c0_15, %c0_16], %41 {strides = array<i32>} : memref<1x256xf32, #tpu.memory_space<vmem>>, vector<1x256xf32>,
    %c0_17 = arith.constant 0 : index
    %c0_18 = arith.constant 0 : index
    %43 = vector.load %arg7[%c0_17, %c0_18] : memref<1x256xf32, #tpu.memory_space<vmem>>, vector<1x256xf32>
    %44 = arith.extui %18 : vector<1x256xi1> to vector<1x256xi32>
    %45 = arith.sitofp %44 : vector<1x256xi32> to vector<1x256xf32>
    %46 = arith.addf %43, %45 : vector<1x256xf32>
    %c0_19 = arith.constant 0 : index
    %c0_20 = arith.constant 0 : index
    %47 = vector.load %arg7[%c0_19, %c0_20] : memref<1x256xf32, #tpu.memory_space<vmem>>, vector<1x256xf32>
    tpu.vector_store %arg7[%c0_19, %c0_20], %46 {strides = array<i32>} : memref<1x256xf32, #tpu.memory_space<vmem>>, vector<1x256xf32>,
    %c0_i32_21 = arith.constant 0 : i32
    %48 = arith.cmpi eq, %arg1, %c0_i32_21 : i32
    %49 = arith.extui %48 : i1 to i32
    %c0_i32_22 = arith.constant 0 : i32
    %50 = arith.cmpi ne, %49, %c0_i32_22 : i32
    scf.if %50 {
      %c0_23 = arith.constant 0 : index
      %c0_24 = arith.constant 0 : index
      %51 = vector.load %arg6[%c0_23, %c0_24] : memref<1x256xf32, #tpu.memory_space<vmem>>, vector<1x256xf32>
      %cst_25 = arith.constant dense<0.000000e+00> : vector<1xf32>
      %52 = vector.multi_reduction <add>, %51, %cst_25 [1] : vector<1x256xf32> to vector<1xf32>
      %53 = vector.shape_cast %52 : vector<1xf32> to vector<1x1xf32>
      %c0_26 = arith.constant 0 : index
      %c0_27 = arith.constant 0 : index
      %54 = vector.load %arg7[%c0_26, %c0_27] : memref<1x256xf32, #tpu.memory_space<vmem>>, vector<1x256xf32>
      %cst_28 = arith.constant dense<0.000000e+00> : vector<1xf32>
      %55 = vector.multi_reduction <add>, %54, %cst_28 [1] : vector<1x256xf32> to vector<1xf32>
      %56 = vector.shape_cast %55 : vector<1xf32> to vector<1x1xf32>
      %57 = vector.shape_cast %53 : vector<1x1xf32> to vector<1x1x1xf32>
      %c0_29 = arith.constant 0 : index
      %c0_30 = arith.constant 0 : index
      %c0_31 = arith.constant 0 : index
      %58 = vector.load %arg4[%c0_29, %c0_30, %c0_31] : memref<1x1x1xf32, #tpu.memory_space<vmem>>, vector<1x1x1xf32>
      tpu.vector_store %arg4[%c0_29, %c0_30, %c0_31], %57 {strides = array<i32>} : memref<1x1x1xf32, #tpu.memory_space<vmem>>, vector<1x1x1xf32>,
      %59 = vector.shape_cast %56 : vector<1x1xf32> to vector<1x1x1xf32>
      %c0_32 = arith.constant 0 : index
      %c0_33 = arith.constant 0 : index
      %c0_34 = arith.constant 0 : index
      %60 = vector.load %arg5[%c0_32, %c0_33, %c0_34] : memref<1x1x1xf32, #tpu.memory_space<vmem>>, vector<1x1x1xf32>
      tpu.vector_store %arg5[%c0_32, %c0_33, %c0_34], %59 {strides = array<i32>} : memref<1x1x1xf32, #tpu.memory_space<vmem>>, vector<1x1x1xf32>,
    } else {
    }
    return
  }
  func.func @transform_0(%arg0: i32, %arg1: i32) -> (i32, i32, i32) {
    %c0_i32 = arith.constant 0 : i32
    %c0_i32_0 = arith.constant 0 : i32
    return %arg0, %c0_i32, %arg1 : i32, i32, i32
  }
  func.func @transform_1(%arg0: i32, %arg1: i32) -> (i32, i32, i32) {
    %c0_i32 = arith.constant 0 : i32
    %c0_i32_0 = arith.constant 0 : i32
    return %arg0, %c0_i32, %arg1 : i32, i32, i32
  }
  func.func @transform_2(%arg0: i32, %arg1: i32) -> (i32, i32, i32) {
    %c0_i32 = arith.constant 0 : i32
    %c0_i32_0 = arith.constant 0 : i32
    %c0_i32_1 = arith.constant 0 : i32
    return %arg0, %c0_i32, %c0_i32_0 : i32, i32, i32
  }
  func.func @transform_3(%arg0: i32, %arg1: i32) -> (i32, i32, i32) {
    %c0_i32 = arith.constant 0 : i32
    %c0_i32_0 = arith.constant 0 : i32
    %c0_i32_1 = arith.constant 0 : i32
    return %arg0, %c0_i32, %c0_i32_0 : i32, i32, i32
  }
}

</mosaic_0001>

<bundles_post_ra>
// kernel: tpu_custom_call.1
= control target key start
LH: loop header
LB: loop body
LE: loop exit
PB: predicated region body
PF: predicated region fallthrough
CT: control target
= control target key end

     0   :  { %9 = vsyncpa [#allocation5], 0  ;;  %s1011_s0 = inlined_call_operand.hbm [shape: f32[2,4,256], index: 0, kind: input, shape index: {}]   ;;  %s1012_s1 = inlined_call_operand.hbm [shape: s32[2,1,256], index: 1, kind: input, shape index: {}]   ;;  %s1013_s2 = inlined_call_operand.vmem [shape: f32[2,1,1], index: 2, kind: output, shape index: {0}]   ;;  %s1014_s3 = inlined_call_operand.vmem [shape: f32[2,1,1], index: 3, kind: output, shape index: {1}]  }
   0x1   :  { %11 = vsyncpa [#allocation5 + $0x1], 0 }
   0x2   :  { %12 = vsyncpa [#allocation7], 0 }
   0x3   :  { %14 = vsyncpa [#allocation7 + $0x1], 0  ;;  %s798_s12 = smov 0   ;;  %s800_s13 = smov 0  }
   0x4   :  { %s802_s14 = smov 0   ;;  %s804_s15 = smov 0  }
   0x5   :  { %s806_s16 = smov 0   ;;  %s808_s17 = smov 0  }
   0x6 LB: > { %s569_s18 = sadd.s32 4294967295, %s771_s17   ;;  %s32_s19 = sadd.s32 1, %s767_s16  ;;  %s771_s17 = sphi %s808_s17, %s20_s17   ;;  %s767_s16 = sphi %s806_s16, %s1032_s16   ;;  %s763_s15 = sphi %s804_s15, %s1031_s15   ;;  %s759_s14 = sphi %s802_s14, %s1030_s14   ;;  %s755_s13 = sphi %s800_s13, %s1029_s13   ;;  %s751_s12 = sphi %s798_s12, %s1028_s12  }
   0x7   : > { %p34_p0 = scmp.ge.s32.totalorder %s32_s19, 2  ;;  %s41_s20 = sadd.s32 1, %s759_s14 }
   0x8   : > { %p48_p1 = scmp.ne.s32.totalorder %s759_s14, %s755_s13  ;;  %p49_p2 = scmp.eq.s32.totalorder %s771_s17, 0 }
   0x9   : > { %s1034_s19 = smov (%p34_p0, %s32_s19), 0  ;;  %p54_p4 = scmp.ne.s32.totalorder %s755_s13, %s751_s12 }
   0xa   : > { %p834_p3 = por %p49_p2, %p48_p1  ;;  %s36_s22 = ssub.s32 %s767_s16, %s1034_s19 }
   0xb   : > { %p55_p5 = scmp.eq.s32.totalorder %s569_s18, 0  ;;  %p39_p6 = scmp.eq.s32.totalorder %s36_s22, 0 }
   0xc   : > { %p598_p8 = scmp.lt.s32.totalorder %s771_s17, 2  ;;  %s850_s25 = sand.u32 1, %s759_s14  }
   0xd   : > { %p841_p7 = por %p55_p5, %p54_p4  ;;  %s585_s26 = sshll.u32 %s767_s16, 7 }
   0xe   : > { %s847_s24 = scalar_select %p39_p6, %s759_s14, %s41_s20  }
   0xf   : > { %s1017_s23 = scalar_select %p841_p7, 1, 0 }
  0x10   : > { %s573_s27 = sshll.u32 %s850_s25, 3  ;;  %s857_s30 = scalar_lea.hbm %s1011_s0, %s585_s26 }
  0x11   : > { %s162_s4 = scalar_lea.vmem [#allocation4], %s573_s27  ;;  %p861_p9 = pnand %p598_p8, %p834_p3 }
  0x12   : > { %s172_s5 = sshll.u32 %s162_s4, 4  ;;  %s159_s7 = scalar_lea.sflag [#allocation5], %s850_s25  ;;  %s865_s5 = int_to_ptr.vmem [resolvable:$true] %s172_s5 }
  0x13   : > { %s657_s8 = scalar_lea.hbm %s857_s30, 128  ;;  %p659_p13 = pneg %p861_p9 }
  0x14   : > { %p658_p12 = scmp.ne.s32.totalorder %s857_s30, %s657_s8  ;;  %s662_s11 = scalar_lea.hbm %s1011_s0, 256 }
  0x15   : > { %p663_p2 = scmp.lt.u32.totalorder %s857_s30, %s1011_s0  ;;  %p664_p3 = scmp.lt.u32.totalorder %s662_s11, %s657_s8 }
  0x16   : > { %p660_p0 = pnand %p659_p13, %p658_p12  ;;  %p666_p5 = scmp.lt.u32.totalorder %s657_s8, %s857_s30 }
  0x17   : > { %p665_p4 = por %p664_p3, %p663_p2 }
  0x18   : > { %p661_p1 = pneg %p660_p0 }
  0x19   : > { %p667_p6 = por %p666_p5, %p665_p4 }
  0x1b   : > { %p668_p8 = pnand %p667_p6, %p661_p1 }
  0x1d   : > { %671 = shalt.err (!%p668_p8)
}
  0x1e   : > { %s672_s20 = scalar_lea.vmem %s865_s5, 128  ;;  %s773_s21 = smov [#allocation4]  }
  0x1f   : > { %p673_p12 = scmp.ne.s32.totalorder %s865_s5, %s672_s20  ;;  %s677_s22 = sshll.u32 %s773_s21, 4  ;;  %s678_s22 = int_to_ptr.vmem [resolvable:$false] %s677_s22 }
  0x20   : > { %s679_s26 = scalar_lea.vmem %s678_s22, 256  ;;  %p680_p11 = scmp.lt.s32.totalorder %s865_s5, %s678_s22 }
  0x21   : > { %p675_p0 = pnand %p673_p12, %p659_p13  ;;  %p681_p2 = scmp.lt.s32.totalorder %s679_s26, %s672_s20 }
  0x23   : > { %p676_p10 = pneg %p675_p0  ;;  %p682_p3 = por %p681_p2, %p680_p11 }
  0x25   : > { %p683_p4 = pnand %p682_p3, %p676_p10 }
  0x27   : > { %686 = shalt.err (!%p683_p4)
}
  0x28   : > { %594 = dma.hbm_to_vmem [thread:$0]  (!%p861_p9), %s857_s30, 128, %s865_s5, %s159_s7  }
  0x29   : > { %p1019_p1 = scmp.lt.s32.totalorder %s771_s17, 3  ;;  %p1020_p5 = scmp.ge.s32.totalorder %s771_s17, 1 }
  0x2a   : > { %s576_s28 = sshll.u32 %s850_s25, 1  ;;  %s586_s29 = sshll.u32 %s767_s16, 5 }
  0x2b   : > { %p899_p6 = pnand %p1020_p5, %p1019_p1  ;;  %s908_s9 = scalar_lea.hbm %s1012_s1, %s586_s29 }
  0x2c   : > { %s183_s10 = scalar_lea.vmem [#allocation6], %s576_s28  ;;  %s180_s30 = scalar_lea.sflag [#allocation7], %s850_s25 }
  0x2d   : > { %s1021_s27 = scalar_select %p899_p6, 1, 0 }
  0x2e   : > { %s193_s11 = sshll.u32 %s183_s10, 4  ;;  %s687_s5 = scalar_lea.hbm %s908_s9, 32  ;;  %s194_s11 = int_to_ptr.vmem [resolvable:$true] %s193_s11 }
  0x2f   : > { %p688_p10 = scmp.ne.s32.totalorder %s908_s9, %s687_s5  ;;  %s692_s18 = scalar_lea.hbm %s1012_s1, 64 }
  0x30   : > { %p693_p12 = scmp.lt.u32.totalorder %s908_s9, %s1012_s1  ;;  %p694_p0 = scmp.lt.u32.totalorder %s692_s18, %s687_s5 }
  0x31   : > { %p690_p11 = pnand %p688_p10, %p659_p13  ;;  %p696_p3 = scmp.lt.u32.totalorder %s687_s5, %s908_s9 }
  0x32   : > { %p695_p2 = por %p694_p0, %p693_p12 }
  0x33   : > { %p691_p8 = pneg %p690_p11 }
  0x34   : > { %p697_p4 = por %p696_p3, %p695_p2 }
  0x36   : > { %p698_p1 = pnand %p697_p4, %p691_p8 }
  0x38   : > { %701 = shalt.err (!%p698_p1)
}
  0x39   : > { %s702_s25 = scalar_lea.vmem %s194_s11, 32  ;;  %s774_s22 = smov [#allocation6]  }
  0x3a   : > { %p703_p5 = scmp.ne.s32.totalorder %s194_s11, %s702_s25  ;;  %s707_s26 = sshll.u32 %s774_s22, 4  ;;  %s708_s26 = int_to_ptr.vmem [resolvable:$false] %s707_s26 }
  0x3b   : > { %s709_s28 = scalar_lea.vmem %s708_s26, 64  ;;  %p710_p7 = scmp.lt.s32.totalorder %s194_s11, %s708_s26 }
  0x3c   : > { %p705_p10 = pnand %p703_p5, %p659_p13  ;;  %p711_p6 = scmp.lt.s32.totalorder %s709_s28, %s702_s25 }
  0x3e   : > { %p706_p11 = pneg %p705_p10  ;;  %p712_p0 = por %p711_p6, %p710_p7 }
  0x40   : > { %p713_p12 = pnand %p712_p0, %p706_p11 }
  0x42   : > { %716 = shalt.err (!%p713_p12)
}
  0x43   : > { %597 = dma.hbm_to_vmem [thread:$0]  (!%p861_p9), %s908_s9, 32, %s194_s11, %s180_s30  }
  0x44   : > { %p1022_p8 = scmp.ne.s32.totalorder %s1021_s27, 0 }
  0x45   : > { %s204_s29 = sand.u32 (!%p1022_p8), 1, %s755_s13   ;;  %p1023_p13 = scmp.ne.s32.totalorder (!%p1022_p8), %s1017_s23, 0 }
  0x46   : > { %202 = sbr.rel (%p1022_p8) target bundleno = 315 (0x13b), region = 28  ;;  %s580_s4 = sshll.u32 (!%p1022_p8), %s204_s29, 3 }
  0x47   : > { %s205_s8 = scalar_lea.sflag (!%p1022_p8), [#allocation5], %s204_s29  ;;  %s208_s10 = scalar_lea.vmem (!%p1022_p8), [#allocation4], %s580_s4 }
  0x4d   : > { %742 = dma.done.wait (%p1023_p13), %s205_s8, 128  }
  0x4e   : > { %744 = vsyncadd (%p1023_p13), %s205_s8, 4294967168  ;;  %s581_s5 = sshll.u32 %s204_s29, 1  ;;  %s214_s7 = scalar_lea.sflag [#allocation7], %s204_s29 }
  0x4f   : > { %s217_s6 = scalar_lea.vmem [#allocation6], %s581_s5 }
  0x50   : > { %746 = dma.done.wait (%p1023_p13), %s214_s7, 32  }
  0x51   : > { %748 = vsyncadd (%p1023_p13), %s214_s7, 4294967264  ;;  %v258_v0 = vlaneseq  ;;  %v775_v1 = vmov 1966171168   ;;  %v776_v5 = vmov 0.0   ;;  %v777_v6 = vmov 1   ;;  %v264_v10 = vld [vmem:[%s208_s10] sm:$0xff] }
  0x52   : > { %v282_v2 = vunpack.c.l.s4 %v775_v1  ;;  %v280_v7 = vcombine.low %v777_v6, %v777_v6  ;;  %vm301_vm1 = vcmask 1043456   ;;  %v265_v11 = vld [vmem:[%s217_s6] sm:$0x3]  ;;  %v299_v13 = vcombine.high %v264_v10, %v264_v10  ;;  %p248_p7 = scmp.lt.s32.totalorder %s763_s15, 1 }
  0x53   : > { %vm941_vm0 = vcmp.lt.s32.totalorder %v258_v0, 256  ;;  %v285_v4 = vshrl.u32 %v258_v0, 7  ;;  %vm275_vm2 = vcmp.ge.s32.totalorder %v265_v11, 0  ;;  %vm276_vm3 = vcmp.ne.s32.totalorder %v265_v11, 255 }
  0x54   : > { %262 = vst.msk [vmem:[#allocation2] sm:$0x3] %vm941_vm0, %v776_v5  ;;  %263 = vst.msk [vmem:[#allocation3] sm:$0x3] %vm941_vm0, %v776_v5  ;;  %v283_v8 = vunpack.c.0.s8 %v282_v2  ;;  %v302_v14 = vsel %vm301_vm1, %v264_v10, -inf  ;;  %v309_v17 = vsel %vm301_vm1, %v299_v13, -inf }
  0x55   : > { %vm277_vm4 = vmand %vm275_vm2, %vm276_vm3  ;;  %v303_v16 = vrot.slane %v302_v14, 4  ;;  %v310_v19 = vrot.slane %v309_v17, 4  ;;  %v963_v36 = vsub.s32 0, %v285_v4  ;;  %v967_v38 = vsub.s32 1, %v285_v4  ;;  %s1036_s15 = smov (!%p248_p7, %s763_s15), 1 }
  0x56   : > { %v949_v9 = vsub.s32 %v283_v8, %v285_v4  ;;  %vm422_vm9 = vcmask 1040384   ;;  %s250_s9 = scalar_lea.vmem %s1013_s2, %s1036_s15  ;;  %vm445_vm10 = vcmask 0   ;;  %s253_s12 = scalar_lea.vmem %s1014_s3, %s1036_s15 }
  0x57   : > { %v304_v18 = vmax.f32 %v302_v14, %v303_v16  ;;  %v311_v23 = vmax.f32 %v309_v17, %v310_v19 }
  0x58   : > { %v287_v12 = vrot.slane %v280_v7, %v949_v9 }
  0x59   : > { %v305_v22 = vrot.slane %v304_v18, 2  ;;  %v312_v27 = vrot.slane %v311_v23, 2 }
  0x5a   : > { %v294_v15 = vrot.slane %v287_v12, %v949_v9 }
  0x5b   : > { %v402_v20 = vld [vmem:[#allocation3] sm:$0x3]  ;;  %v306_v26 = vmax.f32 %v304_v18, %v305_v22  ;;  %v313_v29 = vmax.f32 %v311_v23, %v312_v27  ;;  %v376_v22 = vld [vmem:[#allocation2] sm:$0x3] }
  0x5c   : > { %vm295_vm5 = vcmp.ne.s32.totalorder %v294_v15, 0 }
  0x5d   : > { %vm955_vm6 = vmand %vm277_vm4, %vm295_vm5  ;;  %v307_v28 = vrot.slane %v306_v26, 1  ;;  %v314_v31 = vrot.slane %v313_v29, 1 }
  0x5e   : > { %v582_v24 = vsel %vm955_vm6, 1.0, %v776_v5  ;;  %v297_v37 = vsel %vm955_vm6, %v265_v11, 0 }
  0x5f   : > { %v405_v25 = vadd.f32 %v582_v24, %v402_v20  ;;  %v308_v30 = vmax.f32 %v306_v26, %v307_v28  ;;  %v315_v32 = vmax.f32 %v313_v29, %v314_v31  ;;  %v351_v39 = vrot.slane %v297_v37, %v963_v36 }
  0x60   : > { %v355_v40 = vrot.slane %v297_v37, %v967_v38 }
  0x61   : > { %406 = vst.msk [vmem:[#allocation3] sm:$0x3] %vm941_vm0, %v405_v25  ;;  %v318_v33 = vcombine.low %v308_v30, %v315_v32  ;;  %vm356_vm7 = vcmp.eq.s32.totalorder %v285_v4, %v351_v39 }
  0x62   : > { %vm357_vm8 = vcmp.eq.s32.totalorder %v285_v4, %v355_v40  ;;  %v358_v41 = vsel %vm356_vm7, %v264_v10, 0.0 }
  0x63   : > { %v320_v34 = vsub.f32 %v264_v10, %v318_v33  ;;  %v359_v45 = vsel %vm357_vm8, %v299_v13, 0.0  ;;  %v360_v47 = vsel %vm301_vm1, %v358_v41, 0.0 }
  0x64   : > { %v367_v51 = vsel %vm301_vm1, %v359_v45, 0.0  ;;  %v361_v52 = vrot.slane %v360_v47, 4 }
  0x65   : > { %v321_v35 = vmul.f32 1.442695, %v320_v34  ;;  %v368_v55 = vrot.slane %v367_v51, 4 }
  0x66   : > { %v362_v58 = vadd.f32 %v361_v52, %v360_v47 }
  0x67   : > { %651 = vpow2.f32 %v321_v35  ;;  %v369_v61 = vadd.f32 %v368_v55, %v367_v51 }
  0x68   : > { %v363_v0 = vrot.slane %v362_v58, 2  ;;  %v428_v26 = vld [vmem:[#allocation3] sm:$0x3] }
  0x69   : > { %v370_v2 = vrot.slane %v369_v61, 2  ;;  %v433_v27 = vrot.slane %v428_v26, %v963_v36  ;;  %v437_v28 = vrot.slane %v428_v26, %v967_v38 }
  0x6a   : > { %v364_v4 = vadd.f32 %v363_v0, %v362_v58 }
  0x6b   : > { %v371_v5 = vadd.f32 %v370_v2, %v369_v61  ;;  %v441_v33 = vsel %vm422_vm9, %v437_v28, 0.0 }
  0x6c   : > { %v365_v6 = vrot.slane %v364_v4, 1 }
  0x6d   : > { %v372_v7 = vrot.slane %v371_v5, 1 }
  0x6e   : > { %v366_v11 = vadd.f32 %v365_v6, %v364_v4 }
  0x6f   : > { %v373_v15 = vadd.f32 %v372_v7, %v371_v5 }
  0x71   : > { %v652_v42 = vpop.eup %651 }
  0x72   : > { %v324_v43 = vcombine.high %v652_v42, %v652_v42  ;;  %v326_v44 = vsel %vm301_vm1, %v652_v42, 0.0 }
  0x73   : > { %v327_v46 = vrot.slane %v326_v44, 4 }
  0x74   : > { %v333_v48 = vsel %vm301_vm1, %v324_v43, 0.0 }
  0x75   : > { %v328_v49 = vadd.f32 %v327_v46, %v326_v44  ;;  %v334_v50 = vrot.slane %v333_v48, 4 }
  0x77   : > { %v329_v53 = vrot.slane %v328_v49, 2  ;;  %v335_v54 = vadd.f32 %v334_v50, %v333_v48 }
  0x79   : > { %v330_v56 = vadd.f32 %v329_v53, %v328_v49  ;;  %v336_v57 = vrot.slane %v335_v54, 2 }
  0x7b   : > { %v331_v59 = vrot.slane %v330_v56, 1  ;;  %v337_v60 = vadd.f32 %v336_v57, %v335_v54 }
  0x7d   : > { %v332_v62 = vadd.f32 %v331_v59, %v330_v56  ;;  %v338_v63 = vrot.slane %v337_v60, 1 }
  0x7f   : > { %v339_v1 = vadd.f32 %v338_v63, %v337_v60  ;;  %653 = vlog2.f32 %v332_v62 }
  0x81   : > { %655 = vlog2.f32 %v339_v1 }
  0x89   : > { %v654_v8 = vpop.eup %653 }
  0x8a   : > { %v341_v10 = vmul.f32 0.6931472, %v654_v8 }
  0x8b   : > { %v656_v12 = vpop.eup %655 }
  0x8c   : > { %v343_v13 = vmul.f32 0.6931472, %v656_v12  ;;  %v344_v14 = vadd.f32 %v341_v10, %v308_v30 }
  0x8e   : > { %v345_v16 = vadd.f32 %v343_v13, %v315_v32  ;;  %v374_v17 = vsub.f32 %v344_v14, %v366_v11  ;;  %v440_v32 = vsel %vm422_vm9, %v433_v27, 0.0 }
  0x8f   : > { %v442_v3 = vadd.f32 %v441_v33, %v440_v32 }
  0x90   : > { %v375_v18 = vsub.f32 %v345_v16, %v373_v15 }
  0x92   : > { %v379_v19 = vcombine.low %v374_v17, %v375_v18 }
  0x94   : > { %v386_v20 = vrot.slane %v379_v19, %v949_v9 }
  0x96   : > { %v393_v23 = vrot.slane %v386_v20, %v949_v9 }
  0x98   : > { %v395_v24 = vsel %vm955_vm6, %v393_v23, 0.0 }
  0x99   : > { %v396_v25 = vadd.f32 %v395_v24, %v376_v22 }
  0x9b   : > { %401 = vst.msk [vmem:[#allocation2] sm:$0x3] %vm941_vm0, %v396_v25 }
  0xa2   : > { %v410_v29 = vld [vmem:[#allocation2] sm:$0x3] }
  0xa3   : > { %v415_v30 = vrot.slane %v410_v29, %v963_v36  ;;  %v419_v9 = vrot.slane %v410_v29, %v967_v38 }
  0xa5   : > { %v423_v31 = vsel %vm422_vm9, %v415_v30, 0.0  ;;  %v424_v21 = vsel %vm422_vm9, %v419_v9, 0.0 }
  0xa6   : > { %v425_v34 = vadd.f32 %v424_v21, %v423_v31 }
  0xa8   : > { %426 = vadd.xlane.f32.xlu0 %v425_v34 }
  0xac   : > { %443 = vadd.xlane.f32.xlu0 %v442_v3 }
 0x135   : > { %v427_v35 = vpop.xlane.xlu0 %426 }
 0x136   : > { %446 = vst.msk [vmem:[%s250_s9] sm:$0x1] %vm445_vm10, %v427_v35 }
 0x139   : > { %v444_v36 = vpop.xlane.xlu0 %443 }
 0x13a   : > { %447 = vst.msk [vmem:[%s253_s12] sm:$0x1] %vm445_vm10, %v444_v36 }
 0x13b PF: > { %s20_s17 = sadd.s32 1, %s771_s17   ;;  %s1028_s12 = smov %s755_s13 }
 0x13c   : > { %p17_p9 = scmp.ge.s32.totalorder %s20_s17, 4   ;;  %s1029_s13 = smov %s759_s14 }
 0x13d   : > { %s1030_s14 = smov %s847_s24  ;;  %s1031_s15 = smov %s767_s16 }
 0x13e   : > { %s1032_s16 = smov %s1034_s19  ;;  %19 = sbr.rel (!%p17_p9) target bundleno = 6 (0x6), region = 101 }
 0x145   :  { %477 = vsyncpa [#allocation5], 1 }
 0x146   :  { %479 = vsyncpa [#allocation5 + $0x1], 1 }
 0x147   :  { %480 = vsyncpa [#allocation7], 1 }
 0x148   :  { %482 = vsyncpa [#allocation7 + $0x1], 1 }

</bundles_post_ra>
